<compile_context>
chip_gen: v5e
topology: v5e:2x2
jax: 0.10.0
libtpu: 0.0.40
codegen_flags: <defaults>
</compile_context>

<pallas_src>
import jax
import jax.numpy as jnp
import numpy as np
from jax.experimental import pallas as pl
from jax.experimental.pallas import tpu as pltpu


def _round_up(v, m):
    return ((v + m - 1) // m) * m


def _causal_conv_head_kernel(x_ref, p_ref, means_ref, stds_ref):
    """x_ref : (block_n, Lb) VMEM input rows (Lb = round_up(L, 128); lanes >= L hold
               garbage that only ever lands in masked or clipped output columns).
       p_ref : (8,) SMEM  [w00, w01, w02, b0, 0.5*w10, 0.5*w11, 0.5*w12, 0.5*b1]
       means_ref, stds_ref : (block_n, Lb) VMEM output blocks (clipped to L at writeback).
    """
    x = x_ref[...]
    col = jax.lax.broadcasted_iota(jnp.int32, x.shape, dimension=1)
    valid = col >= 1  # single mask reused for all three shifts (VALU trim)

    # x[t-s] via chained shift-by-1 rotates (pltpu.roll == jnp.roll semantics:
    # result[t] = x[(t-1) mod Lb]).  Because each previous shift already zeroed its
    # leading column, the only lane that ever receives wrapped data is column 0,
    # which `valid` masks to the causal zero-padding value.
    x_m1 = jnp.where(valid, pltpu.roll(x, 1, 1), 0.0)
    x_m2 = jnp.where(valid, pltpu.roll(x_m1, 1, 1), 0.0)
    x_m3 = jnp.where(valid, pltpu.roll(x_m2, 1, 1), 0.0)

    means_ref[...] = p_ref[3] + p_ref[0] * x_m3 + p_ref[1] * x_m2 + p_ref[2] * x_m1
    # 0.5 factor pre-folded into p[4:8]; exp goes to the EUP (free slot for a
    # bandwidth-bound kernel).
    stds_ref[...] = jnp.exp(
        p_ref[7] + p_ref[4] * x_m3 + p_ref[5] * x_m2 + p_ref[6] * x_m1)


def _pick_block_n(n, row_bytes, target_bytes, min_steps):
    """Rows per block: multiple of 8 (sublane alignment required by the rotate op),
    sized for ~target_bytes of input per block, but capped so the batch grid keeps
    >= min_steps steps when N is large enough (keeps both v7x TensorCores busy and
    the double-buffered DMA pipeline rolling)."""
    bn = max(8, (target_bytes // row_bytes) // 8 * 8)
    if n >= min_steps * 8:
        bn = min(bn, max(8, (n // min_steps) // 8 * 8))
    return min(bn, _round_up(n, 8))


def network_forward(x, cur_gt, weight, bias, *,
                    target_block_bytes=4 << 20, min_steps=4):
    """Forward pass of `Network`.

    x      : (N, 1, L) float32  (PyTorch NCL layout)
    cur_gt : unused (kept to mirror the PyTorch forward signature)
    weight : (2, 1, 3) float32  Conv1d weight (out_ch, in_ch, k)
    bias   : (2,)      float32
    returns (means, stds), each (N, L) float32
    """
    del cur_gt  # unused in the reference forward
    N, C, L = x.shape
    assert C == 1
    x2d = x.reshape(N, L)  # metadata-only squeeze of the unit channel dim

    # Lane-aligned *block* width; the HBM arrays stay (N, L).
    Lb = _round_up(L, 128)
    block_n = _pick_block_n(N, Lb * 4, target_block_bytes, min_steps)
    grid = (pl.cdiv(N, block_n),)

    # Flatten conv params into one 1-D SMEM array; fold 0.5 into the log-var head.
    w = weight.reshape(2, 3).astype(jnp.float32)
    b = bias.astype(jnp.float32)
    params = jnp.concatenate([w[0], b[0:1], 0.5 * w[1], 0.5 * b[1:2]])  # (8,)

    # Footprint-derived VMEM limit: 2 pipeline buffers x (1 input + 2 output) blocks,
    # plus margin; clamped to stay within v7x's 64 MiB physical VMEM per TensorCore.
    block_bytes = block_n * Lb * 4
    vmem_limit = int(min(64 << 20, max(32 << 20, 6 * block_bytes + (8 << 20))))

    means, stds = pl.pallas_call(
        _causal_conv_head_kernel,
        out_shape=(jax.ShapeDtypeStruct((N, L), jnp.float32),
                   jax.ShapeDtypeStruct((N, L), jnp.float32)),
        grid=grid,
        in_specs=[
            pl.BlockSpec((block_n, Lb), lambda i: (i, 0)),       # x block (VMEM)
            pl.BlockSpec(memory_space=pltpu.MemorySpace.SMEM),   # 8 scalar params (SMEM)
        ],
        out_specs=(
            pl.BlockSpec((block_n, Lb), lambda i: (i, 0)),
            pl.BlockSpec((block_n, Lb), lambda i: (i, 0)),
        ),
        compiler_params=pltpu.CompilerParams(
            dimension_semantics=("parallel",),   # megacore: split batch across TCs
            vmem_limit_bytes=vmem_limit,
        ),
        cost_estimate=pl.CostEstimate(
            flops=int(12 * N * L),
            transcendentals=int(N * L),
            bytes_accessed=int(3 * N * L * 4 + 32),
        ),
    )(x2d, params)
    return means, stds


def _reference_forward(x, weight, bias):
    """Pure-numpy reference mirroring the PyTorch semantics (f64 accumulate)."""
    N, _, L = x.shape
    x2d = np.asarray(x)[:, 0, :].astype(np.float64)
    xp = np.pad(x2d, ((0, 0), (3, 0)))
    w = np.asarray(weight).reshape(2, 3).astype(np.float64)
    b = np.asarray(bias).astype(np.float64)
    out = np.zeros((N, 2, L), np.float64)
    for c in range(2):
        out[:, c, :] = (b[c]
                        + w[c, 0] * xp[:, 0:L]
                        + w[c, 1] * xp[:, 1:L + 1]
                        + w[c, 2] * xp[:, 2:L + 2])
    return out[:, 0, :], np.exp(0.5 * out[:, 1, :])


if __name__ == "__main__":
    key = jax.random.PRNGKey(0)
    k_w, k_b, k_x = jax.random.split(key, 3)

    # Deterministic Conv1d(1, 2, 3) parameter init (uniform(-1/sqrt(fan_in*k), +...)).
    bound = 1.0 / np.sqrt(1 * 3)
    weight = jax.random.uniform(k_w, (2, 1, 3), jnp.float32, -bound, bound)
    bias = jax.random.uniform(k_b, (2,), jnp.float32, -bound, bound)

    # Cases cover: tiny single-block; lane-aligned L; multi-step grid with a partial
    # final N block, L > 128 (multi-vreg shift) and L not a multiple of 128.
    for case_idx, (N, L) in enumerate([(2, 16), (8, 256), (44, 1000)]):
        kx, kg = jax.random.split(jax.random.fold_in(k_x, case_idx))
        x = jax.random.normal(kx, (N, 1, L), dtype=jnp.float32)
        cur_gt = jax.random.normal(kg, (N, 1, L), dtype=jnp.float32)  # unused, as in reference

        means, stds = jax.block_until_ready(network_forward(x, cur_gt, weight, bias))

        ref_means, ref_stds = _reference_forward(x, weight, bias)
        np.testing.assert_allclose(np.asarray(means), ref_means, rtol=1e-5, atol=1e-5)
        np.testing.assert_allclose(np.asarray(stds), ref_stds, rtol=1e-5, atol=1e-5)

    print("KERNEL_OK")
</pallas_src>

<mosaic_0001>
module attributes {stable_mosaic.version = 11 : i64} {
  func.func @_causal_conv_head_kernel(%arg0: i32, %arg1: memref<8x128xf32, #tpu.memory_space<vmem>>, %arg2: memref<8xf32, #tpu.memory_space<smem>>, %arg3: memref<8x128xf32, #tpu.memory_space<vmem>>, %arg4: memref<8x128xf32, #tpu.memory_space<vmem>>) attributes {dimension_semantics = [#tpu.dimension_semantics<parallel>], iteration_bounds = array<i64: 1>, scalar_prefetch = 0 : i64, scratch_operands = 0 : i64, tpu.core_type = #tpu.core_type<tc>, window_params = [{transform_indices = @transform_0, window_bounds = array<i64: 8, 128>}, {transform_indices = @transform_1, window_bounds = array<i64: 8>}, {transform_indices = @transform_2, window_bounds = array<i64: 8, 128>}, {transform_indices = @transform_3, window_bounds = array<i64: 8, 128>}]} {
    %c0 = arith.constant 0 : index
    %c0_0 = arith.constant 0 : index
    %0 = vector.load %arg1[%c0, %c0_0] : memref<8x128xf32, #tpu.memory_space<vmem>>, vector<8x128xf32>
    %1 = tpu.iota {dimensions = array<i32: 1>} : vector<8x128xi32>
    %c1_i32 = arith.constant 1 : i32
    %2 = vector.broadcast %c1_i32 : i32 to vector<8x128xi32>
    %3 = arith.cmpi sge, %1, %2 : vector<8x128xi32>
    %c1_i32_1 = arith.constant 1 : i32
    %4 = tpu.dynamic_rotate %0 by %c1_i32_1 dim 1 : vector<8x128xf32>, i32 -> vector<8x128xf32>
    %cst = arith.constant 0.000000e+00 : f32
    %5 = vector.broadcast %cst : f32 to vector<8x128xf32>
    %6 = arith.select %3, %4, %5 : vector<8x128xi1>, vector<8x128xf32>
    %c1_i32_2 = arith.constant 1 : i32
    %7 = tpu.dynamic_rotate %6 by %c1_i32_2 dim 1 : vector<8x128xf32>, i32 -> vector<8x128xf32>
    %cst_3 = arith.constant 0.000000e+00 : f32
    %8 = vector.broadcast %cst_3 : f32 to vector<8x128xf32>
    %9 = arith.select %3, %7, %8 : vector<8x128xi1>, vector<8x128xf32>
    %c1_i32_4 = arith.constant 1 : i32
    %10 = tpu.dynamic_rotate %9 by %c1_i32_4 dim 1 : vector<8x128xf32>, i32 -> vector<8x128xf32>
    %cst_5 = arith.constant 0.000000e+00 : f32
    %11 = vector.broadcast %cst_5 : f32 to vector<8x128xf32>
    %12 = arith.select %3, %10, %11 : vector<8x128xi1>, vector<8x128xf32>
    %c3 = arith.constant 3 : index
    %13 = memref.load %arg2[%c3] : memref<8xf32, #tpu.memory_space<smem>>
    %c0_6 = arith.constant 0 : index
    %14 = memref.load %arg2[%c0_6] : memref<8xf32, #tpu.memory_space<smem>>
    %15 = vector.broadcast %14 : f32 to vector<8x128xf32>
    %16 = arith.mulf %15, %12 : vector<8x128xf32>
    %17 = vector.broadcast %13 : f32 to vector<8x128xf32>
    %18 = arith.addf %17, %16 : vector<8x128xf32>
    %c1 = arith.constant 1 : index
    %19 = memref.load %arg2[%c1] : memref<8xf32, #tpu.memory_space<smem>>
    %20 = vector.broadcast %19 : f32 to vector<8x128xf32>
    %21 = arith.mulf %20, %9 : vector<8x128xf32>
    %22 = arith.addf %18, %21 : vector<8x128xf32>
    %c2 = arith.constant 2 : index
    %23 = memref.load %arg2[%c2] : memref<8xf32, #tpu.memory_space<smem>>
    %24 = vector.broadcast %23 : f32 to vector<8x128xf32>
    %25 = arith.mulf %24, %6 : vector<8x128xf32>
    %26 = arith.addf %22, %25 : vector<8x128xf32>
    %c0_7 = arith.constant 0 : index
    %c0_8 = arith.constant 0 : index
    %27 = vector.load %arg3[%c0_7, %c0_8] : memref<8x128xf32, #tpu.memory_space<vmem>>, vector<8x128xf32>
    tpu.vector_store %arg3[%c0_7, %c0_8], %26 {strides = array<i32>} : memref<8x128xf32, #tpu.memory_space<vmem>>, vector<8x128xf32>,
    %c7 = arith.constant 7 : index
    %28 = memref.load %arg2[%c7] : memref<8xf32, #tpu.memory_space<smem>>
    %c4 = arith.constant 4 : index
    %29 = memref.load %arg2[%c4] : memref<8xf32, #tpu.memory_space<smem>>
    %30 = vector.broadcast %29 : f32 to vector<8x128xf32>
    %31 = arith.mulf %30, %12 : vector<8x128xf32>
    %32 = vector.broadcast %28 : f32 to vector<8x128xf32>
    %33 = arith.addf %32, %31 : vector<8x128xf32>
    %c5 = arith.constant 5 : index
    %34 = memref.load %arg2[%c5] : memref<8xf32, #tpu.memory_space<smem>>
    %35 = vector.broadcast %34 : f32 to vector<8x128xf32>
    %36 = arith.mulf %35, %9 : vector<8x128xf32>
    %37 = arith.addf %33, %36 : vector<8x128xf32>
    %c6 = arith.constant 6 : index
    %38 = memref.load %arg2[%c6] : memref<8xf32, #tpu.memory_space<smem>>
    %39 = vector.broadcast %38 : f32 to vector<8x128xf32>
    %40 = arith.mulf %39, %6 : vector<8x128xf32>
    %41 = arith.addf %37, %40 : vector<8x128xf32>
    %42 = math.exp %41 : vector<8x128xf32>
    %c0_9 = arith.constant 0 : index
    %c0_10 = arith.constant 0 : index
    %43 = vector.load %arg4[%c0_9, %c0_10] : memref<8x128xf32, #tpu.memory_space<vmem>>, vector<8x128xf32>
    tpu.vector_store %arg4[%c0_9, %c0_10], %42 {strides = array<i32>} : memref<8x128xf32, #tpu.memory_space<vmem>>, vector<8x128xf32>,
    return
  }
  func.func @transform_0(%arg0: i32) -> (i32, i32) {
    %c0_i32 = arith.constant 0 : i32
    %c0_i32_0 = arith.constant 0 : i32
    return %arg0, %c0_i32 : i32, i32
  }
  func.func @transform_1(%arg0: i32) -> i32 {
    %c0_i32 = arith.constant 0 : i32
    %c0_i32_0 = arith.constant 0 : i32
    return %c0_i32 : i32
  }
  func.func @transform_2(%arg0: i32) -> (i32, i32) {
    %c0_i32 = arith.constant 0 : i32
    %c0_i32_0 = arith.constant 0 : i32
    return %arg0, %c0_i32 : i32, i32
  }
  func.func @transform_3(%arg0: i32) -> (i32, i32) {
    %c0_i32 = arith.constant 0 : i32
    %c0_i32_0 = arith.constant 0 : i32
    return %arg0, %c0_i32 : i32, i32
  }
}

</mosaic_0001>

<bundles_post_ra>
// kernel: tpu_custom_call.1
= control target key start
LH: loop header
LB: loop body
LE: loop exit
PB: predicated region body
PF: predicated region fallthrough
CT: control target
= control target key end

     0   :  { %9 = vsyncpa [#allocation3], 0  ;;  %s286_s0 = inlined_call_operand.hbm [shape: f32[2,16], index: 0, kind: input, shape index: {}]   ;;  %s287_s1 = inlined_call_operand.hbm [shape: f32[8], index: 1, kind: input, shape index: {}]   ;;  %s288_s2 = inlined_call_operand.hbm [shape: f32[2,16], index: 2, kind: output, shape index: {0}]   ;;  %s289_s3 = inlined_call_operand.hbm [shape: f32[2,16], index: 3, kind: output, shape index: {1}]  }
   0x1   :  { %10 = vsyncpa [#allocation5], 0 }
   0x2   :  { %11 = vsyncpa [#allocation4], 0 }
   0x3   :  { %12 = vsyncpa [#allocation9], 0 }
   0x4   :  { %16 = vsyncadd [#allocation3], 96  ;;  %s17_s14 = sshll.u32 %s286_s0, 4  ;;  %s235_s15 = smov [#allocation2]   ;;  %s18_s14 = int_to_ptr.hbm [resolvable:$true] %s17_s14 }
   0x5   :  { %s19_s16 = sshll.u32 %s235_s15, 4  ;;  %s31_s19 = sshll.u32 %s287_s1, 4  ;;  %s20_s16 = int_to_ptr.vmem [resolvable:$true] %s19_s16  ;;  %s32_s19 = int_to_ptr.hbm [resolvable:$true] %s31_s19 }
   0x6   :  { %s236_s20 = smov 32   ;;  %s237_s21 = smov 2  }
   0x7   :  { %25 = dma.hbm_to_vmem [thread:$0]  %s18_s14, 32, %s20_s16, [#allocation3], %s236_s20, %s236_s20, %s237_s21  }
   0x8   :  { %s238_s22 = smov [#allocation6]  }
   0x9   :  { %34 = dma.hbm_to_smem %s32_s19, 16, %s238_s22, [#allocation5]  }
   0xa   :  { %227 = dma.done.wait [#allocation3], 128  }
   0xb   :  { %228 = vsyncadd [#allocation3], 4294967168 }
   0xc   :  { %229 = dma.done.wait [#allocation5], 16  }
   0xd   :  { %230 = vsyncadd [#allocation5], 4294967280 }
   0xe   :  { %43 = sfence }
   0xf   :  { %v44_v0 = vld [vmem:[#allocation2] sm:$0xff]  ;;  %s239_s0 = smov 1   ;;  %v45_v1 = vlaneseq  ;;  %s128_s1 = sld [smem:[#allocation6 + $0x1]] }
  0x10   :  { %48 = vrot.lane.b32.xlu0 %v44_v0, %s239_s0  ;;  %s132_s23 = sld [smem:[#allocation6 + $0x5]] }
  0x11   :  { %v46_v2 = vand.u32 127, %v45_v1  ;;  %s58_s24 = sld [smem:[#allocation6]] }
  0x12   :  { %s131_s25 = sld [smem:[#allocation6 + $0x4]] }
  0x13   :  { %vm47_vm0 = vcmp.ge.s32.totalorder %v46_v2, 1  ;;  %s127_s26 = sld [smem:[#allocation6 + $0x3]] }
  0x14   :  { %s130_s27 = sld [smem:[#allocation6 + $0x7]] }
  0x15   :  { %s129_s28 = sld [smem:[#allocation6 + $0x2]]  ;;  %v64_v9 = vstv %s128_s1 }
  0x16   :  { %s133_s29 = sld [smem:[#allocation6 + $0x6]]  ;;  %v79_v11 = vstv %s132_s23 }
  0x17   :  { %v59_v7 = vstv %s58_s24 }
  0x18   :  { %v74_v8 = vstv %s131_s25 }
  0x19   :  { %v61_v12 = vstv %s127_s26 }
  0x1a   :  { %v76_v13 = vstv %s130_s27 }
  0x1b   :  { %v68_v17 = vstv %s129_s28 }
  0x1c   :  { %v83_v18 = vstv %s133_s29 }
  0x82   :  { %v49_v3 = vpop.permute.xlu0 %48 }
  0x83   :  { %v50_v4 = vsel %vm47_vm0, %v49_v3, 0.0 }
  0x84   :  { %51 = vrot.lane.b32.xlu0 %v50_v4, %s239_s0  ;;  %v69_v23 = vmul.f32 %v68_v17, %v50_v4  ;;  %v84_v24 = vmul.f32 %v83_v18, %v50_v4 }
  0xf6   :  { %v52_v5 = vpop.permute.xlu0 %51 }
  0xf7   :  { %v53_v6 = vsel %vm47_vm0, %v52_v5, 0.0 }
  0xf8   :  { %54 = vrot.lane.b32.xlu1 %v53_v6, %s239_s0  ;;  %v65_v19 = vmul.f32 %v64_v9, %v53_v6  ;;  %v80_v20 = vmul.f32 %v79_v11, %v53_v6 }
 0x16a   :  { %v55_v10 = vpop.permute.xlu1 %54 }
 0x16b   :  { %v56_v14 = vsel %vm47_vm0, %v55_v10, 0.0 }
 0x16c   :  { %v60_v15 = vmul.f32 %v59_v7, %v56_v14  ;;  %v75_v16 = vmul.f32 %v74_v8, %v56_v14 }
 0x16e   :  { %v62_v21 = vadd.f32 %v61_v12, %v60_v15  ;;  %v77_v22 = vadd.f32 %v76_v13, %v75_v16 }
 0x170   :  { %v66_v25 = vadd.f32 %v65_v19, %v62_v21  ;;  %v81_v26 = vadd.f32 %v80_v20, %v77_v22 }
 0x172   :  { %v70_v27 = vadd.f32 %v69_v23, %v66_v25  ;;  %v85_v28 = vadd.f32 %v84_v24, %v81_v26 }
 0x174   :  { %71 = vst [vmem:[#allocation7] sm:$0xff] %v70_v27  ;;  %v86_v29 = vmul.f32 1.442695, %v85_v28 }
 0x176   :  { %141 = vpow2.f32 %v86_v29 }
 0x17c   :  { %v142_v30 = vpop.eup %141 }
 0x17d   :  { %88 = vst [vmem:[#allocation8] sm:$0xff] %v142_v30 }
 0x17e   :  { %92 = vsyncadd [#allocation4], 96  ;;  %s95_s5 = sshll.u32 %s288_s2, 4  ;;  %s240_s6 = smov [#allocation7]   ;;  %s96_s5 = int_to_ptr.hbm [resolvable:$true] %s95_s5 }
 0x17f   :  { %s93_s7 = sshll.u32 %s240_s6, 4  ;;  %s94_s7 = int_to_ptr.vmem [resolvable:$true] %s93_s7 }
 0x180   :  { %101 = dma.vmem_to_hbm [thread:$0]  %s94_s7, 32, %s96_s5, [#allocation4], %s236_s20, %s236_s20, %s237_s21  }
 0x181   :  { %105 = vsyncadd [#allocation9], 96  ;;  %s108_s10 = sshll.u32 %s289_s3, 4  ;;  %s241_s11 = smov [#allocation8]   ;;  %s109_s10 = int_to_ptr.hbm [resolvable:$true] %s108_s10 }
 0x182   :  { %s106_s12 = sshll.u32 %s241_s11, 4  ;;  %s107_s12 = int_to_ptr.vmem [resolvable:$true] %s106_s12 }
 0x183   :  { %114 = dma.vmem_to_hbm [thread:$0]  %s107_s12, 32, %s109_s10, [#allocation9], %s236_s20, %s236_s20, %s237_s21  }
 0x184   :  { %231 = dma.done.wait [#allocation4], 128  }
 0x185   :  { %232 = vsyncadd [#allocation4], 4294967168 }
 0x186   :  { %233 = dma.done.wait [#allocation9], 128  }
 0x187   :  { %234 = vsyncadd [#allocation9], 4294967168 }
 0x188   :  { %123 = vsyncpa [#allocation3], 1 }
 0x189   :  { %124 = vsyncpa [#allocation4], 1 }
 0x18a   :  { %125 = vsyncpa [#allocation9], 1 }
 0x18b   :  { %126 = vsyncpa [#allocation5], 1 }

</bundles_post_ra>
